<compile_context>
chip_gen: v7x
topology: tpu7x:2x2x1
jax: 0.10.0
libtpu: 0.0.40
codegen_flags: <defaults>
</compile_context>

<pallas_src>
import math
import jax
import jax.numpy as jnp
from jax.experimental import pallas as pl
from jax.experimental.pallas import tpu as pltpu

_GELU_C = math.sqrt(2.0 / math.pi)


def mlp_kernel(x_ref, w_fc_ref, b_fc_ref, w_proj_ref, b_proj_ref, o_ref, acc_ref):
    # x_ref:      (tm, C)  bf16
    # w_fc_ref:   (C, th)  bf16     b_fc_ref:   (1, th)  f32
    # w_proj_ref: (th, C)  bf16     b_proj_ref: (1, C)   f32
    # o_ref:      (tm, C)  f32      acc_ref:    (tm, C)  f32 scratch
    k = pl.program_id(1)

    @pl.when(k == 0)
    def _():
        # Fold the c_proj bias into the accumulator once per row tile.
        acc_ref[...] = jnp.broadcast_to(b_proj_ref[...], acc_ref.shape)

    # c_fc partial slab: bf16 operands on the MXU, f32 accumulation.
    h = jnp.dot(x_ref[...], w_fc_ref[...], preferred_element_type=jnp.float32)
    h = h + b_fc_ref[...]  # (1, th) broadcast over (tm, th), in f32

    # GELU with tanh approximation (matches nn.GELU(approximate='tanh')), f32 math.
    g = 0.5 * h * (1.0 + jnp.tanh(_GELU_C * (h + 0.044715 * h * h * h)))

    # c_proj partial: cast g to bf16 for the MXU, accumulate in f32.
    acc_ref[...] += jnp.dot(g.astype(w_proj_ref.dtype), w_proj_ref[...],
                            preferred_element_type=jnp.float32)

    @pl.when(k == pl.num_programs(1) - 1)
    def _():
        o_ref[...] = acc_ref[...].astype(o_ref.dtype)


def mlp_forward(x, w_fc, b_fc, w_proj, b_proj, *, tm=256, th=512):
    """x: (B, T, C) float32.  Returns (B, T, C) float32."""
    B, T, C = x.shape
    H = w_fc.shape[1]
    M = B * T

    # Clamp tile sizes for small problems.
    tm = min(tm, M)
    th = min(th, H)
    if H % th != 0:
        th = H  # fallback: keep the full hidden dim in one slab

    # Pad the token dim to a multiple of tm; padded rows are dropped at the end.
    Mg = ((M + tm - 1) // tm) * tm
    x2d = x.reshape(M, C).astype(jnp.bfloat16)
    if Mg != M:
        x2d = jnp.pad(x2d, ((0, Mg - M), (0, 0)))

    w_fc_b = w_fc.astype(jnp.bfloat16)
    w_proj_b = w_proj.astype(jnp.bfloat16)
    b_fc2d = b_fc.reshape(1, H).astype(jnp.float32)
    b_proj2d = b_proj.reshape(1, C).astype(jnp.float32)

    # NOTE: for the toy C=32 test the output last dim is sub-128 (masked stores);
    # real GPT-2 C (768+) is lane-dense and unaffected.
    out2d = pl.pallas_call(
        mlp_kernel,
        out_shape=jax.ShapeDtypeStruct((Mg, C), jnp.float32),
        grid_spec=pltpu.PrefetchScalarGridSpec(
            num_scalar_prefetch=0,
            grid=(Mg // tm, H // th),
            in_specs=[
                pl.BlockSpec((tm, C), lambda i, k: (i, 0)),   # x row tile (reused across k)
                pl.BlockSpec((C, th), lambda i, k: (0, k)),   # w_fc hidden slab
                pl.BlockSpec((1, th), lambda i, k: (0, k)),   # b_fc hidden slab
                pl.BlockSpec((th, C), lambda i, k: (k, 0)),   # w_proj hidden slab
                pl.BlockSpec((1, C), lambda i, k: (0, 0)),    # b_proj (resident)
            ],
            out_specs=pl.BlockSpec((tm, C), lambda i, k: (i, 0)),
            scratch_shapes=[pltpu.VMEM((tm, C), jnp.float32)],
        ),
        compiler_params=pltpu.CompilerParams(
            dimension_semantics=("parallel", "arbitrary"),
            vmem_limit_bytes=56 * 1024 * 1024,  # safe on v5e/v6e (128 MiB) and v7x (64 MiB)
        ),
    )(x2d, w_fc_b, b_fc2d, w_proj_b, b_proj2d)

    return out2d[:M].reshape(B, T, C).astype(x.dtype)


def reference_mlp(x, w_fc, b_fc, w_proj, b_proj):
    """Pure-JAX reference with the same bf16 operand quantization as the kernel."""
    xq = x.astype(jnp.bfloat16).astype(jnp.float32)
    wfq = w_fc.astype(jnp.bfloat16).astype(jnp.float32)
    wpq = w_proj.astype(jnp.bfloat16).astype(jnp.float32)
    h = jnp.einsum("btc,ch->bth", xq, wfq,
                   precision=jax.lax.Precision.HIGHEST) + b_fc
    g = 0.5 * h * (1.0 + jnp.tanh(_GELU_C * (h + 0.044715 * h ** 3)))
    gq = g.astype(jnp.bfloat16).astype(jnp.float32)
    return jnp.einsum("bth,hc->btc", gq, wpq,
                      precision=jax.lax.Precision.HIGHEST) + b_proj


if __name__ == "__main__":
    # Small, forward-consistent shapes: batch=2, seq=8, n_embed=32 -> hidden=128.
    B, T, n_embed = 2, 8, 32
    hidden = 4 * n_embed

    key = jax.random.PRNGKey(0)
    kx, kw1, kb1, kw2, kb2 = jax.random.split(key, 5)

    x = jax.random.normal(kx, (B, T, n_embed), dtype=jnp.float32)
    w_fc = jax.random.normal(kw1, (n_embed, hidden), dtype=jnp.float32) * (1.0 / math.sqrt(n_embed))
    b_fc = jax.random.normal(kb1, (hidden,), dtype=jnp.float32) * 0.01
    w_proj = jax.random.normal(kw2, (hidden, n_embed), dtype=jnp.float32) * (1.0 / math.sqrt(hidden))
    b_proj = jax.random.normal(kb2, (n_embed,), dtype=jnp.float32) * 0.01

    out = mlp_forward(x, w_fc, b_fc, w_proj, b_proj)
    out = jax.block_until_ready(out)

    ref = reference_mlp(x, w_fc, b_fc, w_proj, b_proj)
    assert out.shape == (B, T, n_embed)
    assert jnp.allclose(out, ref, atol=1e-2, rtol=1e-2), "mismatch vs reference"

    print("KERNEL_OK")
</pallas_src>

<mosaic_0001>
module attributes {stable_mosaic.version = 11 : i64} {
  func.func @mlp_kernel(%arg0: i32, %arg1: i32, %arg2: memref<16x32xbf16, #tpu.memory_space<vmem>>, %arg3: memref<32x128xbf16, #tpu.memory_space<vmem>>, %arg4: memref<1x128xf32, #tpu.memory_space<vmem>>, %arg5: memref<128x32xbf16, #tpu.memory_space<vmem>>, %arg6: memref<1x32xf32, #tpu.memory_space<vmem>>, %arg7: memref<16x32xf32, #tpu.memory_space<vmem>>, %arg8: memref<16x32xf32, #tpu.memory_space<vmem>>) attributes {dimension_semantics = [#tpu.dimension_semantics<parallel>, #tpu.dimension_semantics<arbitrary>], iteration_bounds = array<i64: 1, 1>, scalar_prefetch = 0 : i64, scratch_operands = 1 : i64, tpu.core_type = #tpu.core_type<tc>, window_params = [{transform_indices = @transform_0, window_bounds = array<i64: 16, 32>}, {transform_indices = @transform_1, window_bounds = array<i64: 32, 128>}, {transform_indices = @transform_2, window_bounds = array<i64: 1, 128>}, {transform_indices = @transform_3, window_bounds = array<i64: 128, 32>}, {pipeline_mode = #tpu.pipeline_mode<synchronous>, transform_indices = @transform_4, window_bounds = array<i64: 1, 32>}, {transform_indices = @transform_5, window_bounds = array<i64: 16, 32>}]} {
    %c0_i32 = arith.constant 0 : i32
    %0 = arith.cmpi eq, %arg1, %c0_i32 : i32
    %1 = arith.extui %0 : i1 to i32
    %c0_i32_0 = arith.constant 0 : i32
    %2 = arith.cmpi ne, %1, %c0_i32_0 : i32
    scf.if %2 {
      %c0_19 = arith.constant 0 : index
      %c0_20 = arith.constant 0 : index
      %31 = vector.load %arg6[%c0_19, %c0_20] : memref<1x32xf32, #tpu.memory_space<vmem>>, vector<1x32xf32>
      %32 = vector.shape_cast %31 : vector<1x32xf32> to vector<1x32xf32>
      %33 = vector.broadcast %32 : vector<1x32xf32> to vector<16x32xf32>
      %c0_21 = arith.constant 0 : index
      %c0_22 = arith.constant 0 : index
      %34 = vector.load %arg8[%c0_21, %c0_22] : memref<16x32xf32, #tpu.memory_space<vmem>>, vector<16x32xf32>
      tpu.vector_store %arg8[%c0_21, %c0_22], %33 {strides = array<i32>} : memref<16x32xf32, #tpu.memory_space<vmem>>, vector<16x32xf32>,
    } else {
    }
    %c0 = arith.constant 0 : index
    %c0_1 = arith.constant 0 : index
    %3 = vector.load %arg2[%c0, %c0_1] : memref<16x32xbf16, #tpu.memory_space<vmem>>, vector<16x32xbf16>
    %c0_2 = arith.constant 0 : index
    %c0_3 = arith.constant 0 : index
    %4 = vector.load %arg3[%c0_2, %c0_3] : memref<32x128xbf16, #tpu.memory_space<vmem>>, vector<32x128xbf16>
    %cst = arith.constant dense<0.000000e+00> : vector<16x128xf32>
    %5 = tpu.matmul %3, %4, %cst {dimension_numbers = #tpu.dot_dimension_numbers<[1], [0], [0], [1], [0, 0, 1, 1], [], []>} : vector<16x32xbf16>, vector<32x128xbf16>, vector<16x128xf32> -> vector<16x128xf32>
    %c0_4 = arith.constant 0 : index
    %c0_5 = arith.constant 0 : index
    %6 = vector.load %arg4[%c0_4, %c0_5] : memref<1x128xf32, #tpu.memory_space<vmem>>, vector<1x128xf32>
    %7 = vector.broadcast %6 : vector<1x128xf32> to vector<16x128xf32>
    %8 = arith.addf %5, %7 : vector<16x128xf32>
    %cst_6 = arith.constant 5.000000e-01 : f32
    %9 = vector.broadcast %cst_6 : f32 to vector<16x128xf32>
    %10 = arith.mulf %9, %8 : vector<16x128xf32>
    %cst_7 = arith.constant 4.471500e-02 : f32
    %11 = vector.broadcast %cst_7 : f32 to vector<16x128xf32>
    %12 = arith.mulf %11, %8 : vector<16x128xf32>
    %13 = arith.mulf %12, %8 : vector<16x128xf32>
    %14 = arith.mulf %13, %8 : vector<16x128xf32>
    %15 = arith.addf %8, %14 : vector<16x128xf32>
    %cst_8 = arith.constant 0.797884583 : f32
    %16 = vector.broadcast %cst_8 : f32 to vector<16x128xf32>
    %17 = arith.mulf %16, %15 : vector<16x128xf32>
    %18 = math.tanh %17 : vector<16x128xf32>
    %cst_9 = arith.constant 1.000000e+00 : f32
    %19 = vector.broadcast %cst_9 : f32 to vector<16x128xf32>
    %20 = arith.addf %19, %18 : vector<16x128xf32>
    %21 = arith.mulf %10, %20 : vector<16x128xf32>
    %c0_10 = arith.constant 0 : index
    %c0_11 = arith.constant 0 : index
    %22 = vector.load %arg8[%c0_10, %c0_11] : memref<16x32xf32, #tpu.memory_space<vmem>>, vector<16x32xf32>
    %23 = arith.truncf %21 : vector<16x128xf32> to vector<16x128xbf16>
    %c0_12 = arith.constant 0 : index
    %c0_13 = arith.constant 0 : index
    %24 = vector.load %arg5[%c0_12, %c0_13] : memref<128x32xbf16, #tpu.memory_space<vmem>>, vector<128x32xbf16>
    %cst_14 = arith.constant dense<0.000000e+00> : vector<16x32xf32>
    %25 = tpu.matmul %23, %24, %cst_14 {dimension_numbers = #tpu.dot_dimension_numbers<[1], [0], [0], [1], [0, 0, 1, 1], [], []>} : vector<16x128xbf16>, vector<128x32xbf16>, vector<16x32xf32> -> vector<16x32xf32>
    %26 = arith.addf %22, %25 : vector<16x32xf32>
    %c0_15 = arith.constant 0 : index
    %c0_16 = arith.constant 0 : index
    %27 = vector.load %arg8[%c0_15, %c0_16] : memref<16x32xf32, #tpu.memory_space<vmem>>, vector<16x32xf32>
    tpu.vector_store %arg8[%c0_15, %c0_16], %26 {strides = array<i32>} : memref<16x32xf32, #tpu.memory_space<vmem>>, vector<16x32xf32>,
    %c0_i32_17 = arith.constant 0 : i32
    %28 = arith.cmpi eq, %arg1, %c0_i32_17 : i32
    %29 = arith.extui %28 : i1 to i32
    %c0_i32_18 = arith.constant 0 : i32
    %30 = arith.cmpi ne, %29, %c0_i32_18 : i32
    scf.if %30 {
      %c0_19 = arith.constant 0 : index
      %c0_20 = arith.constant 0 : index
      %31 = vector.load %arg8[%c0_19, %c0_20] : memref<16x32xf32, #tpu.memory_space<vmem>>, vector<16x32xf32>
      %c0_21 = arith.constant 0 : index
      %c0_22 = arith.constant 0 : index
      %32 = vector.load %arg7[%c0_21, %c0_22] : memref<16x32xf32, #tpu.memory_space<vmem>>, vector<16x32xf32>
      tpu.vector_store %arg7[%c0_21, %c0_22], %31 {strides = array<i32>} : memref<16x32xf32, #tpu.memory_space<vmem>>, vector<16x32xf32>,
    } else {
    }
    return
  }
  func.func @transform_0(%arg0: i32, %arg1: i32) -> (i32, i32) {
    %c0_i32 = arith.constant 0 : i32
    %c0_i32_0 = arith.constant 0 : i32
    return %arg0, %c0_i32 : i32, i32
  }
  func.func @transform_1(%arg0: i32, %arg1: i32) -> (i32, i32) {
    %c0_i32 = arith.constant 0 : i32
    %c0_i32_0 = arith.constant 0 : i32
    return %c0_i32, %arg1 : i32, i32
  }
  func.func @transform_2(%arg0: i32, %arg1: i32) -> (i32, i32) {
    %c0_i32 = arith.constant 0 : i32
    %c0_i32_0 = arith.constant 0 : i32
    return %c0_i32, %arg1 : i32, i32
  }
  func.func @transform_3(%arg0: i32, %arg1: i32) -> (i32, i32) {
    %c0_i32 = arith.constant 0 : i32
    %c0_i32_0 = arith.constant 0 : i32
    return %arg1, %c0_i32 : i32, i32
  }
  func.func @transform_4(%arg0: i32, %arg1: i32) -> (i32, i32) {
    %c0_i32 = arith.constant 0 : i32
    %c0_i32_0 = arith.constant 0 : i32
    %c0_i32_1 = arith.constant 0 : i32
    return %c0_i32, %c0_i32_0 : i32, i32
  }
  func.func @transform_5(%arg0: i32, %arg1: i32) -> (i32, i32) {
    %c0_i32 = arith.constant 0 : i32
    %c0_i32_0 = arith.constant 0 : i32
    return %arg0, %c0_i32 : i32, i32
  }
}

</mosaic_0001>

<bundles_post_ra>
// kernel: tpu_custom_call.1
= control target key start
LH: loop header
LB: loop body
LE: loop exit
PB: predicated region body
PF: predicated region fallthrough
CT: control target
= control target key end

     0   :  { %v362_v1 = vmov 0.0   ;;  %vm363_vm0 = vmmov 0   ;;  %vm33_vm1 = vcmask 261120   ;;  %s455_s0 = inlined_call_operand.vmem [shape: bf16[16,32], index: 0, kind: input, shape index: {}]   ;;  %s456_s1 = inlined_call_operand.vmem [shape: bf16[32,128], index: 1, kind: input, shape index: {}]   ;;  %s457_s2 = inlined_call_operand.vmem [shape: f32[1,128], index: 2, kind: input, shape index: {}]   ;;  %s458_s3 = inlined_call_operand.vmem [shape: bf16[128,32], index: 3, kind: input, shape index: {}]   ;;  %s459_s4 = inlined_call_operand.vmem [shape: f32[1,32], index: 4, kind: input, shape index: {}]   ;;  %s460_s5 = inlined_call_operand.hbm [shape: f32[16,32], index: 5, kind: output, shape index: {}]  }
   0x1   :  { %v323_v0 = vld [vmem:[%s456_s1] sm:$0xff]   ;;  %290 = vmatprep.subr.bf16.mxu0 %v362_v1  ;;  %298 = vmatprep.subr.bf16.mxu1 %v362_v1  ;;  %v324_v2 = vld [vmem:[%s456_s1 + $0x8] sm:$0xff]  }
   0x2   :  { %291 = vmatpush3.bf16.msra.mxu0 %v323_v0  ;;  %294 = vmatprep.mubr.msk.bf16.mxu0 %vm363_vm0, %v362_v1  ;;  %v325_v3 = vld [vmem:[%s455_s0] sm:$0xff]  }
   0x3   :  { %292 = vmatprep.subr.bf16.mxu0 %v362_v1  ;;  %314 = vmatprep.mubr.msk.bf16.mxu1 %vm363_vm0, %v362_v1 }
   0x6   :  { %293 = vmatpush3.bf16.msra.mxu0 %v324_v2 }
   0x7   :  { %10 = vsyncpa [#allocation4], 0  ;;  %v326_v4 = vld [vmem:[%s458_s3] sm:$0xff]   ;;  %v327_v5 = vld [vmem:[%s458_s3 + $0x8] sm:$0xff]  }
   0x8   :  { %299 = vmatpush3.bf16.msra.mxu1 %v326_v4  ;;  %v328_v6 = vld [vmem:[%s458_s3 + $0x10] sm:$0xff]   ;;  %v329_v7 = vld [vmem:[%s458_s3 + $0x18] sm:$0xff]   ;;  %v330_v8 = vld [vmem:[%s458_s3 + $0x20] sm:$0xff]  }
   0x9   :  { %295 = vmatmul.mubr.msk.bf16.vlgmr.msra.gmra.mrb[0].mxu0 %vm33_vm1, %v325_v3  ;;  %300 = vmatprep.subr.bf16.mxu1 %v362_v1  ;;  %v331_v9 = vld [vmem:[%s458_s3 + $0x28] sm:$0xff]   ;;  %v332_v10 = vld [vmem:[%s458_s3 + $0x30] sm:$0xff]   ;;  %v333_v11 = vld [vmem:[%s458_s3 + $0x38] sm:$0xff]  }
   0xa   :  { %v264_v12 = vld [vmem:[%s459_s4] ss:$0 sm:$0xff] }
   0xb   :  { %34 = vst.msk [vmem:[#allocation2] sm:$0xff] %vm33_vm1, %v264_v12  ;;  %35 = vst.msk [vmem:[#allocation2 + $0x8] sm:$0xff] %vm33_vm1, %v264_v12  ;;  %v265_v13 = vld [vmem:[%s457_s2] ss:$0 sm:$0xff]  ;;  %s364_s2 = smov [#allocation3]  }
   0xc   :  { %301 = vmatpush3.bf16.msra.mxu1 %v327_v5  ;;  %s253_s3 = sshll.u32 %s364_s2, 4  ;;  %s254_s3 = int_to_ptr.vmem [resolvable:$true] %s253_s3 }
   0xd   :  { %302 = vmatprep.subr.bf16.mxu1 %v362_v1  ;;  %s338_s4 = scalar_lea.vmem %s254_s3, 256  ;;  %p343_p1 = scmp.lt.s32.totalorder %s254_s3, %s254_s3 }
   0xe   :  { %p339_p0 = scmp.ne.s32.totalorder %s254_s3, %s338_s4  ;;  %p344_p2 = scmp.lt.s32.totalorder %s338_s4, %s338_s4 }
  0x10   :  { %303 = vmatpush3.bf16.msra.mxu1 %v328_v6  ;;  %p345_p3 = por %p344_p2, %p343_p1 }
  0x11   :  { %304 = vmatprep.subr.bf16.mxu1 %v362_v1 }
  0x12   :  { %v129_v39 = vld [vmem:[#allocation2] sm:$0xff]  ;;  %v130_v41 = vld [vmem:[#allocation2 + $0x8] sm:$0xff]  ;;  %p346_p4 = pnand %p345_p3, %p339_p0 }
  0x14   :  { %305 = vmatpush3.bf16.msra.mxu1 %v329_v7 }
  0x15   :  { %306 = vmatprep.subr.bf16.mxu1 %v362_v1 }
  0x18   :  { %307 = vmatpush3.bf16.msra.mxu1 %v330_v8 }
  0x19   :  { %308 = vmatprep.subr.bf16.mxu1 %v362_v1 }
  0x1c   :  { %309 = vmatpush3.bf16.msra.mxu1 %v331_v9 }
  0x1d   :  { %310 = vmatprep.subr.bf16.mxu1 %v362_v1 }
  0x20   :  { %311 = vmatpush3.bf16.msra.mxu1 %v332_v10 }
  0x21   :  { %312 = vmatprep.subr.bf16.mxu1 %v362_v1 }
  0x24   :  { %313 = vmatpush3.bf16.msra.mxu1 %v333_v11 }
  0xdc   :  { %v104_v14 = vpop.f32.mrb[0].mxu0 }
  0xdd   :  { %v105_v15 = vadd.f32 %v265_v13, %v104_v14  ;;  %v296_v16 = vpop.f32.mrb[1].mxu0 }
  0xde   :  { %v107_v17 = vpop.f32.mrb[2].mxu0 }
  0xdf   :  { %v113_v18 = vmul.f32 0.044715, %v105_v15  ;;  %v108_v19 = vadd.f32 %v265_v13, %v107_v17  ;;  %v297_v20 = vpop.f32.mrb[3].mxu0  ;;  %v111_v33 = vmul.f32 0.5, %v105_v15 }
  0xe1   :  { %v115_v21 = vmul.f32 %v113_v18, %v105_v15  ;;  %v114_v22 = vmul.f32 0.044715, %v108_v19  ;;  %v112_v34 = vmul.f32 0.5, %v108_v19 }
  0xe3   :  { %v117_v23 = vmul.f32 %v115_v21, %v105_v15  ;;  %v116_v24 = vmul.f32 %v114_v22, %v108_v19 }
  0xe5   :  { %v118_v25 = vmul.f32 %v116_v24, %v108_v19  ;;  %v119_v26 = vadd.f32 %v117_v23, %v105_v15 }
  0xe7   :  { %v120_v27 = vadd.f32 %v118_v25, %v108_v19  ;;  %v121_v28 = vmul.f32 0.7978846, %v119_v26 }
  0xe9   :  { %v122_v29 = vmul.f32 0.7978846, %v120_v27  ;;  %334 = vtanh.f32 %v121_v28 }
  0xeb   :  { %336 = vtanh.f32 %v122_v29 }
  0xf3   :  { %v335_v30 = vpop.eup %334 }
  0xf4   :  { %v125_v31 = vadd.f32 1.0, %v335_v30 }
  0xf5   :  { %v337_v32 = vpop.eup %336 }
  0xf6   :  { %v126_v35 = vadd.f32 1.0, %v337_v32  ;;  %v127_v36 = vmul.f32 %v125_v31, %v111_v33 }
  0xf8   :  { %v128_v37 = vmul.f32 %v126_v35, %v112_v34 }
  0xfa   :  { %v131_v38 = vpack.c.bf16 %v128_v37, %v127_v36 }
  0xfc   :  { %315 = vmatmul.mubr.bf16.vlgmr.msra.gmra.mrb[0].mxu1 %v131_v38 }
 0x1cf   :  { %v230_v40 = vpop.f32.mrb[0].mxu1 }
 0x1d0   :  { %v237_v42 = vadd.f32 %v230_v40, %v129_v39  ;;  %v316_v43 = vpop.f32.mrb[1].mxu1 }
 0x1d1   :  { %v233_v44 = vpop.f32.mrb[2].mxu1 }
 0x1d2   :  { %239 = vst.msk [vmem:[#allocation2] sm:$0xff] %vm33_vm1, %v237_v42  ;;  %v238_v45 = vadd.f32 %v233_v44, %v130_v41  ;;  %v317_v46 = vpop.f32.mrb[3].mxu1 }
 0x1d4   :  { %240 = vst.msk [vmem:[#allocation2 + $0x8] sm:$0xff] %vm33_vm1, %v238_v45 }
 0x1d9   :  { %v244_v47 = vld [vmem:[#allocation2] sm:$0xff] }
 0x1da   :  { %246 = vst.msk [vmem:[#allocation3] sm:$0xff] %vm33_vm1, %v244_v47 }
 0x1db   :  { %v245_v48 = vld [vmem:[#allocation2 + $0x8] sm:$0xff] }
 0x1dc   :  { %247 = vst.msk [vmem:[#allocation3 + $0x8] sm:$0xff] %vm33_vm1, %v245_v48 }
 0x1dd   :  { %349 = shalt.err (!%p346_p4)
}
 0x1de   :  { %s350_s19 = scalar_lea.hbm %s460_s5, 256 }
 0x1df   :  { %p351_p5 = scmp.ne.s32.totalorder %s460_s5, %s350_s19  ;;  %p354_p6 = scmp.lt.u32.totalorder %s350_s19, %s460_s5 }
 0x1e1   :  { %p356_p7 = pnand %p354_p6, %p351_p5 }
 0x1e3   :  { %359 = shalt.err (!%p356_p7)
}
 0x1e4   :  { %s365_s24 = smov 128   ;;  %s366_s25 = smov 8  }
 0x1e5   :  { %259 = dma.vmem_to_hbm [thread:$0]  %s254_s3, 256, %s460_s5, [#allocation4], %s365_s24, %s365_s24, %s366_s25  }
 0x1e6   :  { %360 = dma.done.wait [#allocation4], 256  }
 0x1e7   :  { %361 = vsyncadd [#allocation4], 4294967040 }
 0x1e8   :  { %263 = vsyncpa [#allocation4], 1 }

</bundles_post_ra>
